<compile_context>
chip_gen: v6e
topology: v6e:2x2x1
jax: 0.10.0
libtpu: 0.0.40
codegen_flags: <defaults>
</compile_context>

<pallas_src>
from functools import partial

import jax
import jax.numpy as jnp
from jax import lax
from jax.experimental import pallas as pl
from jax.experimental.pallas import tpu as pltpu

_HALO = 128  # lane-aligned halo block width staged on each side of a T tile


# ---------------------------------------------------------------------------
# Kernel: one (batch, T-tile) block of the fused layer.
# ---------------------------------------------------------------------------
def _cdr_kernel(l_ref, c_ref, r_ref, m_ref, wbig_ref, bbig_ref, w1_ref, b1_ref,
                o_ref, *, dilations, hw):
    """
    l_ref : (1, C, hw) f32  left  halo x[:, j*tt-hw : j*tt]      (clamped at j==0)
    c_ref : (1, C, tt) f32  center tile x[:, j*tt : (j+1)*tt]
    r_ref : (1, C, hw) f32  right halo x[:, (j+1)*tt : +hw]      (clamped at last j)
    m_ref : (1, 1, tt) f32  mask[:, 0, tile]
    wbig  : (3*C, 7*C) bf16 packed block weight of the 3 dilated convs
    bbig  : (3*C, 1)   f32  their biases (rows ordered conv1|conv2|conv3)
    w1,b1 : (C, 3*C) bf16, (C, 1) f32 -- the 1x1 conv
    o_ref : (1, C, tt) f32
    """
    j = pl.program_id(1)
    nt = pl.num_programs(1)
    tt = c_ref.shape[2]

    center_f32 = c_ref[0]                         # (C, tt) f32 -- residual + x(t) tap
    center = center_f32.astype(jnp.bfloat16)

    # Sequence-boundary halos: their BlockSpec indices were clamped, so zero
    # them here (this is exactly the convs' zero padding outside [0, T)).
    lscale = jnp.where(j == 0, 0.0, 1.0).astype(jnp.bfloat16)
    rscale = jnp.where(j == nt - 1, 0.0, 1.0).astype(jnp.bfloat16)
    left = l_ref[0].astype(jnp.bfloat16) * lscale       # (C, hw) bf16
    right = r_ref[0].astype(jnp.bfloat16) * rscale      # (C, hw) bf16

    win = jnp.concatenate([left, center, right], axis=1)   # (C, tt + 2*hw) bf16

    # Tap order must match _pack_dilated_weight:
    #   [x(t), x(t-d1), x(t+d1), x(t-d2), x(t+d2), x(t-d3), x(t+d3)]
    taps = [center]
    for d in dilations:
        taps.append(win[:, hw - d:hw - d + tt])          # x(t - d)
        taps.append(win[:, hw + d:hw + d + tt])          # x(t + d)
    xs = jnp.concatenate(taps, axis=0)                   # (7*C, tt) bf16

    # All three dilated K=3 convs (with bias) in one MXU pass.
    y = jnp.dot(wbig_ref[...], xs, preferred_element_type=jnp.float32)
    y = y + bbig_ref[...]
    h = jnp.maximum(y, 0.0).astype(jnp.bfloat16)         # == concat of ReLU'd convs

    # 1x1 conv over the concatenated channels.
    out = jnp.dot(w1_ref[...], h, preferred_element_type=jnp.float32)
    out = out + b1_ref[...]
    # TODO(synk): nn.Dropout() treated as identity (eval-mode semantics).

    o_ref[0] = ((center_f32 + out) * m_ref[0]).astype(o_ref.dtype)


# ---------------------------------------------------------------------------
# Wrapper-side helpers.
# ---------------------------------------------------------------------------
def _pack_dilated_weight(w_convs):
    """(3, Cout, Cin, 3) torch-layout conv weights -> (3*Cout, 7*Cin) block
    weight matching tap order [x(t), x(t-d1), x(t+d1), x(t-d2), x(t+d2),
    x(t-d3), x(t+d3)].  Off-block entries are zero."""
    n, cout, cin, k = w_convs.shape
    assert n == 3 and k == 3
    wbig = jnp.zeros((3 * cout, 7 * cin), jnp.float32)
    for i in range(3):
        rows = slice(i * cout, (i + 1) * cout)
        wbig = wbig.at[rows, 0:cin].set(w_convs[i, :, :, 1])                                # x(t)
        wbig = wbig.at[rows, (1 + 2 * i) * cin:(2 + 2 * i) * cin].set(w_convs[i, :, :, 0])  # x(t-d)
        wbig = wbig.at[rows, (2 + 2 * i) * cin:(3 + 2 * i) * cin].set(w_convs[i, :, :, 2])  # x(t+d)
    return wbig


def _choose_tt(B, T, max_tt=2048, min_parallel_steps=4):
    """Largest 128-multiple tile dividing T that still leaves >= 4 grid steps
    (so v7x's two TensorCores / the pipeline both stay busy)."""
    cands = [c for c in (2048, 1024, 512, 256, 128) if c <= max_tt and T % c == 0]
    assert cands, "padded T must be a multiple of 128"
    for c in cands:
        if B * (T // c) >= min_parallel_steps:
            return c
    return cands[-1]


def combined_dilated_residual_forward(x, mask, params, *, dilations, tt=None):
    """Pallas TPU forward of CombinedDilatedResidualLayer.

    x : (B, C, T) f32 (torch NCT layout), mask : (B, M, T) f32.
    """
    w_convs, b_convs, w_1x1, b_1x1 = params
    B, Cin, T = x.shape
    Cout = w_convs.shape[1]
    assert Cin == Cout, "residual (x + out) requires in_channels == out_channels"
    assert len(dilations) == 3
    assert max(int(d) for d in dilations) <= _HALO

    # Pad T to a multiple of 128; the zero pad is numerically identical to the
    # convs' own zero padding and the padded tail is sliced off afterwards.
    T_orig = T
    if T % _HALO != 0:
        Tp = ((T + _HALO - 1) // _HALO) * _HALO
        x = jnp.pad(x, ((0, 0), (0, 0), (0, Tp - T)))
        mask = jnp.pad(mask, ((0, 0), (0, 0), (0, Tp - T)))
        T = Tp

    if tt is None:
        tt = _choose_tt(B, T)
    assert tt % _HALO == 0 and T % tt == 0
    nt = T // tt
    hw = _HALO
    r = tt // hw          # halo blocks per tile
    nb = T // hw          # total halo blocks along T

    wbig = _pack_dilated_weight(jnp.asarray(w_convs, jnp.float32)).astype(jnp.bfloat16)
    bbig = jnp.asarray(b_convs, jnp.float32).reshape(3 * Cout, 1)
    w1 = jnp.asarray(w_1x1, jnp.float32).astype(jnp.bfloat16)
    b1 = jnp.asarray(b_1x1, jnp.float32).reshape(Cout, 1)

    m = mask[:, 0:1, :].astype(jnp.float32)        # (B, 1, T) lane-dense mask row

    kernel = partial(_cdr_kernel,
                     dilations=tuple(int(d) for d in dilations), hw=hw)

    # Honest scheduling hint (no window duplication any more).
    flops = 2 * B * T * (3 * Cout * 7 * Cin + Cout * 3 * Cout)
    bytes_accessed = int(4 * (B * Cin * T                 # x center read
                              + B * nt * 2 * Cin * hw     # halo reads
                              + B * T                     # mask
                              + B * Cout * T)             # output write
                         + 2 * (wbig.size + w1.size) + 4 * (bbig.size + b1.size))

    out = pl.pallas_call(
        kernel,
        out_shape=jax.ShapeDtypeStruct((B, Cout, T), jnp.float32),
        grid=(B, nt),
        in_specs=[
            # left halo (block index clamped at the sequence start)
            pl.BlockSpec((1, Cin, hw), lambda b, j: (b, 0, jnp.maximum(j * r - 1, 0))),
            # center tile
            pl.BlockSpec((1, Cin, tt), lambda b, j: (b, 0, j)),
            # right halo (block index clamped at the sequence end)
            pl.BlockSpec((1, Cin, hw), lambda b, j: (b, 0, jnp.minimum((j + 1) * r, nb - 1))),
            # mask row
            pl.BlockSpec((1, 1, tt), lambda b, j: (b, 0, j)),
            # weights / biases (constant blocks)
            pl.BlockSpec(wbig.shape, lambda b, j: (0, 0)),
            pl.BlockSpec(bbig.shape, lambda b, j: (0, 0)),
            pl.BlockSpec(w1.shape, lambda b, j: (0, 0)),
            pl.BlockSpec(b1.shape, lambda b, j: (0, 0)),
        ],
        out_specs=pl.BlockSpec((1, Cout, tt), lambda b, j: (b, 0, j)),
        compiler_params=pltpu.CompilerParams(
            dimension_semantics=("parallel", "parallel"),
            vmem_limit_bytes=32 * 1024 * 1024),
        cost_estimate=pl.CostEstimate(flops=int(flops), transcendentals=0,
                                      bytes_accessed=bytes_accessed),
    )(x, x, x, m, wbig, bbig, w1, b1)

    return out[:, :, :T_orig] if T_orig != T else out


# ---------------------------------------------------------------------------
# Synthetic parameters + pure-JAX reference (for the in-script check).
# ---------------------------------------------------------------------------
def init_params(key, in_channels, out_channels, scale=0.1):
    ks = jax.random.split(key, 4)
    w_convs = jax.random.normal(ks[0], (3, out_channels, in_channels, 3), jnp.float32) * scale
    b_convs = jax.random.normal(ks[1], (3, out_channels), jnp.float32) * scale
    w_1x1 = jax.random.normal(ks[2], (out_channels, 3 * out_channels), jnp.float32) * scale
    b_1x1 = jax.random.normal(ks[3], (out_channels,), jnp.float32) * scale
    # Round to bf16-representable values so kernel (bf16 MXU) and f32
    # reference use identical effective weights.
    rt = lambda a: a.astype(jnp.bfloat16).astype(jnp.float32)
    return rt(w_convs), rt(b_convs), rt(w_1x1), rt(b_1x1)


def reference_forward(x, mask, params, dilations):
    """Pure-JAX (XLA) reference of the torch forward, f32 throughout."""
    w_convs, b_convs, w_1x1, b_1x1 = params
    hs = []
    for i, d in enumerate(dilations):
        y = lax.conv_general_dilated(
            x, w_convs[i], window_strides=(1,), padding=[(d, d)],
            rhs_dilation=(d,), dimension_numbers=("NCH", "OIH", "NCH"))
        hs.append(jax.nn.relu(y + b_convs[i][None, :, None]))
    cat = jnp.concatenate(hs, axis=1)                                   # (B, 3C, T)
    out = jnp.einsum("oc,bct->bot", w_1x1, cat) + b_1x1[None, :, None]
    return (x + out) * mask[:, 0:1, :]


if __name__ == "__main__":
    # CombinedDilatedResidualLayer(kernel_size=3, dilation=1, dilation2=2,
    #                              dilation3=4, in_channels=32, out_channels=32)
    # (kernel_size is ignored by the torch module itself: convs hardcode K=3.)
    B, C, T = 2, 32, 512
    dilations = (1, 2, 4)

    key = jax.random.PRNGKey(0)
    kx, km, kp = jax.random.split(key, 3)
    x = jax.random.normal(kx, (B, C, T), jnp.float32)                   # torch NCT
    mask = (jax.random.uniform(km, (B, C, T)) > 0.2).astype(jnp.float32)
    params = init_params(kp, C, C)

    out = combined_dilated_residual_forward(x, mask, params, dilations=dilations)
    out = jax.block_until_ready(out)
    assert out.shape == (B, C, T), out.shape
    assert bool(jnp.all(jnp.isfinite(out)))

    ref = reference_forward(x, mask, params, dilations)
    err = float(jnp.max(jnp.abs(out - ref)))
    assert err < 5e-2, f"max |kernel - reference| = {err}"
    print("KERNEL_OK")
</pallas_src>

<mosaic_0001>
module attributes {stable_mosaic.version = 11 : i64} {
  func.func @_cdr_kernel(%arg0: i32, %arg1: i32, %arg2: memref<1x32x128xf32, #tpu.memory_space<vmem>>, %arg3: memref<1x32x256xf32, #tpu.memory_space<vmem>>, %arg4: memref<1x32x128xf32, #tpu.memory_space<vmem>>, %arg5: memref<1x1x256xf32, #tpu.memory_space<vmem>>, %arg6: memref<96x224xbf16, #tpu.memory_space<vmem>>, %arg7: memref<96x1xf32, #tpu.memory_space<vmem>>, %arg8: memref<32x96xbf16, #tpu.memory_space<vmem>>, %arg9: memref<32x1xf32, #tpu.memory_space<vmem>>, %arg10: memref<1x32x256xf32, #tpu.memory_space<vmem>>) attributes {dimension_semantics = [#tpu.dimension_semantics<parallel>, #tpu.dimension_semantics<parallel>], iteration_bounds = array<i64: 2, 2>, scalar_prefetch = 0 : i64, scratch_operands = 0 : i64, tpu.core_type = #tpu.core_type<tc>, window_params = [{transform_indices = @transform_0, window_bounds = array<i64: 1, 32, 128>}, {transform_indices = @transform_1, window_bounds = array<i64: 1, 32, 256>}, {transform_indices = @transform_2, window_bounds = array<i64: 1, 32, 128>}, {transform_indices = @transform_3, window_bounds = array<i64: 1, 1, 256>}, {pipeline_mode = #tpu.pipeline_mode<synchronous>, transform_indices = @transform_4, window_bounds = array<i64: 96, 224>}, {pipeline_mode = #tpu.pipeline_mode<synchronous>, transform_indices = @transform_5, window_bounds = array<i64: 96, 1>}, {pipeline_mode = #tpu.pipeline_mode<synchronous>, transform_indices = @transform_6, window_bounds = array<i64: 32, 96>}, {pipeline_mode = #tpu.pipeline_mode<synchronous>, transform_indices = @transform_7, window_bounds = array<i64: 32, 1>}, {transform_indices = @transform_8, window_bounds = array<i64: 1, 32, 256>}]} {
    %c0 = arith.constant 0 : index
    %c0_0 = arith.constant 0 : index
    %c0_1 = arith.constant 0 : index
    %0 = vector.load %arg3[%c0, %c0_0, %c0_1] : memref<1x32x256xf32, #tpu.memory_space<vmem>>, vector<1x32x256xf32>
    %1 = vector.shape_cast %0 : vector<1x32x256xf32> to vector<32x256xf32>
    %2 = arith.truncf %1 : vector<32x256xf32> to vector<32x256xbf16>
    %c0_i32 = arith.constant 0 : i32
    %3 = arith.cmpi eq, %arg1, %c0_i32 : i32
    %cst = arith.constant 0.000000e+00 : f32
    %cst_2 = arith.constant 1.000000e+00 : f32
    %4 = arith.select %3, %cst, %cst_2 : f32
    %5 = arith.truncf %4 : f32 to bf16
    %c1_i32 = arith.constant 1 : i32
    %6 = arith.cmpi eq, %arg1, %c1_i32 : i32
    %cst_3 = arith.constant 0.000000e+00 : f32
    %cst_4 = arith.constant 1.000000e+00 : f32
    %7 = arith.select %6, %cst_3, %cst_4 : f32
    %8 = arith.truncf %7 : f32 to bf16
    %c0_5 = arith.constant 0 : index
    %c0_6 = arith.constant 0 : index
    %c0_7 = arith.constant 0 : index
    %9 = vector.load %arg2[%c0_5, %c0_6, %c0_7] : memref<1x32x128xf32, #tpu.memory_space<vmem>>, vector<1x32x128xf32>
    %10 = vector.shape_cast %9 : vector<1x32x128xf32> to vector<32x128xf32>
    %11 = arith.truncf %10 : vector<32x128xf32> to vector<32x128xbf16>
    %12 = vector.broadcast %5 : bf16 to vector<32x128xbf16>
    %13 = arith.mulf %11, %12 : vector<32x128xbf16>
    %c0_8 = arith.constant 0 : index
    %c0_9 = arith.constant 0 : index
    %c0_10 = arith.constant 0 : index
    %14 = vector.load %arg4[%c0_8, %c0_9, %c0_10] : memref<1x32x128xf32, #tpu.memory_space<vmem>>, vector<1x32x128xf32>
    %15 = vector.shape_cast %14 : vector<1x32x128xf32> to vector<32x128xf32>
    %16 = arith.truncf %15 : vector<32x128xf32> to vector<32x128xbf16>
    %17 = vector.broadcast %8 : bf16 to vector<32x128xbf16>
    %18 = arith.mulf %16, %17 : vector<32x128xbf16>
    %19 = tpu.concatenate %13, %2, %18 in 1 : vector<32x128xbf16>, vector<32x256xbf16>, vector<32x128xbf16> -> vector<32x512xbf16>
    %20 = vector.extract_strided_slice %19 {offsets = [0, 127], sizes = [32, 256], strides = [1, 1]} : vector<32x512xbf16> to vector<32x256xbf16>
    %21 = vector.extract_strided_slice %19 {offsets = [0, 129], sizes = [32, 256], strides = [1, 1]} : vector<32x512xbf16> to vector<32x256xbf16>
    %22 = vector.extract_strided_slice %19 {offsets = [0, 126], sizes = [32, 256], strides = [1, 1]} : vector<32x512xbf16> to vector<32x256xbf16>
    %23 = vector.extract_strided_slice %19 {offsets = [0, 130], sizes = [32, 256], strides = [1, 1]} : vector<32x512xbf16> to vector<32x256xbf16>
    %24 = vector.extract_strided_slice %19 {offsets = [0, 124], sizes = [32, 256], strides = [1, 1]} : vector<32x512xbf16> to vector<32x256xbf16>
    %25 = vector.extract_strided_slice %19 {offsets = [0, 132], sizes = [32, 256], strides = [1, 1]} : vector<32x512xbf16> to vector<32x256xbf16>
    %26 = tpu.concatenate %2, %20, %21, %22, %23, %24, %25 in 0 : vector<32x256xbf16>, vector<32x256xbf16>, vector<32x256xbf16>, vector<32x256xbf16>, vector<32x256xbf16>, vector<32x256xbf16>, vector<32x256xbf16> -> vector<224x256xbf16>
    %c0_11 = arith.constant 0 : index
    %c0_12 = arith.constant 0 : index
    %27 = vector.load %arg6[%c0_11, %c0_12] : memref<96x224xbf16, #tpu.memory_space<vmem>>, vector<96x224xbf16>
    %cst_13 = arith.constant dense<0.000000e+00> : vector<96x256xf32>
    %28 = tpu.matmul %27, %26, %cst_13 {dimension_numbers = #tpu.dot_dimension_numbers<[1], [0], [0], [1], [0, 0, 1, 1], [], []>} : vector<96x224xbf16>, vector<224x256xbf16>, vector<96x256xf32> -> vector<96x256xf32>
    %c0_14 = arith.constant 0 : index
    %c0_15 = arith.constant 0 : index
    %29 = vector.load %arg7[%c0_14, %c0_15] : memref<96x1xf32, #tpu.memory_space<vmem>>, vector<96x1xf32>
    %30 = vector.broadcast %29 : vector<96x1xf32> to vector<96x256xf32>
    %31 = arith.addf %28, %30 : vector<96x256xf32>
    %cst_16 = arith.constant 0.000000e+00 : f32
    %32 = vector.broadcast %cst_16 : f32 to vector<96x256xf32>
    %33 = arith.maximumf %31, %32 : vector<96x256xf32>
    %34 = arith.truncf %33 : vector<96x256xf32> to vector<96x256xbf16>
    %c0_17 = arith.constant 0 : index
    %c0_18 = arith.constant 0 : index
    %35 = vector.load %arg8[%c0_17, %c0_18] : memref<32x96xbf16, #tpu.memory_space<vmem>>, vector<32x96xbf16>
    %cst_19 = arith.constant dense<0.000000e+00> : vector<32x256xf32>
    %36 = tpu.matmul %35, %34, %cst_19 {dimension_numbers = #tpu.dot_dimension_numbers<[1], [0], [0], [1], [0, 0, 1, 1], [], []>} : vector<32x96xbf16>, vector<96x256xbf16>, vector<32x256xf32> -> vector<32x256xf32>
    %c0_20 = arith.constant 0 : index
    %c0_21 = arith.constant 0 : index
    %37 = vector.load %arg9[%c0_20, %c0_21] : memref<32x1xf32, #tpu.memory_space<vmem>>, vector<32x1xf32>
    %38 = vector.broadcast %37 : vector<32x1xf32> to vector<32x256xf32>
    %39 = arith.addf %36, %38 : vector<32x256xf32>
    %40 = arith.addf %1, %39 : vector<32x256xf32>
    %c0_22 = arith.constant 0 : index
    %c0_23 = arith.constant 0 : index
    %c0_24 = arith.constant 0 : index
    %41 = vector.load %arg5[%c0_22, %c0_23, %c0_24] : memref<1x1x256xf32, #tpu.memory_space<vmem>>, vector<1x1x256xf32>
    %42 = vector.shape_cast %41 : vector<1x1x256xf32> to vector<1x256xf32>
    %43 = vector.broadcast %42 : vector<1x256xf32> to vector<32x256xf32>
    %44 = arith.mulf %40, %43 : vector<32x256xf32>
    %c0_25 = arith.constant 0 : index
    %c0_26 = arith.constant 0 : index
    %c0_27 = arith.constant 0 : index
    %45 = vector.load %arg10[%c0_25, %c0_26, %c0_27] : memref<1x32x256xf32, #tpu.memory_space<vmem>>, vector<1x32x256xf32>
    %46 = vector.shape_cast %45 : vector<1x32x256xf32> to vector<32x256xf32>
    %47 = vector.shape_cast %44 : vector<32x256xf32> to vector<1x32x256xf32>
    tpu.vector_store %arg10[%c0_25, %c0_26, %c0_27], %47 {strides = array<i32>} : memref<1x32x256xf32, #tpu.memory_space<vmem>>, vector<1x32x256xf32>,
    return
  }
  func.func @transform_0(%arg0: i32, %arg1: i32) -> (i32, i32, i32) {
    %c2_i32 = arith.constant 2 : i32
    %0 = arith.muli %arg1, %c2_i32 : i32
    %c1_i32 = arith.constant 1 : i32
    %1 = arith.subi %0, %c1_i32 : i32
    %c0_i32 = arith.constant 0 : i32
    %2 = arith.maxsi %1, %c0_i32 : i32
    %c0_i32_0 = arith.constant 0 : i32
    %c0_i32_1 = arith.constant 0 : i32
    return %arg0, %c0_i32_0, %2 : i32, i32, i32
  }
  func.func @transform_1(%arg0: i32, %arg1: i32) -> (i32, i32, i32) {
    %c0_i32 = arith.constant 0 : i32
    %c0_i32_0 = arith.constant 0 : i32
    return %arg0, %c0_i32, %arg1 : i32, i32, i32
  }
  func.func @transform_2(%arg0: i32, %arg1: i32) -> (i32, i32, i32) {
    %c1_i32 = arith.constant 1 : i32
    %0 = arith.addi %arg1, %c1_i32 : i32
    %c2_i32 = arith.constant 2 : i32
    %1 = arith.muli %0, %c2_i32 : i32
    %c3_i32 = arith.constant 3 : i32
    %2 = arith.minsi %1, %c3_i32 : i32
    %c0_i32 = arith.constant 0 : i32
    %c0_i32_0 = arith.constant 0 : i32
    return %arg0, %c0_i32, %2 : i32, i32, i32
  }
  func.func @transform_3(%arg0: i32, %arg1: i32) -> (i32, i32, i32) {
    %c0_i32 = arith.constant 0 : i32
    %c0_i32_0 = arith.constant 0 : i32
    return %arg0, %c0_i32, %arg1 : i32, i32, i32
  }
  func.func @transform_4(%arg0: i32, %arg1: i32) -> (i32, i32) {
    %c0_i32 = arith.constant 0 : i32
    %c0_i32_0 = arith.constant 0 : i32
    %c0_i32_1 = arith.constant 0 : i32
    return %c0_i32, %c0_i32_0 : i32, i32
  }
  func.func @transform_5(%arg0: i32, %arg1: i32) -> (i32, i32) {
    %c0_i32 = arith.constant 0 : i32
    %c0_i32_0 = arith.constant 0 : i32
    %c0_i32_1 = arith.constant 0 : i32
    return %c0_i32, %c0_i32_0 : i32, i32
  }
  func.func @transform_6(%arg0: i32, %arg1: i32) -> (i32, i32) {
    %c0_i32 = arith.constant 0 : i32
    %c0_i32_0 = arith.constant 0 : i32
    %c0_i32_1 = arith.constant 0 : i32
    return %c0_i32, %c0_i32_0 : i32, i32
  }
  func.func @transform_7(%arg0: i32, %arg1: i32) -> (i32, i32) {
    %c0_i32 = arith.constant 0 : i32
    %c0_i32_0 = arith.constant 0 : i32
    %c0_i32_1 = arith.constant 0 : i32
    return %c0_i32, %c0_i32_0 : i32, i32
  }
  func.func @transform_8(%arg0: i32, %arg1: i32) -> (i32, i32, i32) {
    %c0_i32 = arith.constant 0 : i32
    %c0_i32_0 = arith.constant 0 : i32
    return %arg0, %c0_i32, %arg1 : i32, i32, i32
  }
}

</mosaic_0001>

<bundles_post_ra>
// kernel: tpu_custom_call.1
= control target key start
LH: loop header
LB: loop body
LE: loop exit
PB: predicated region body
PF: predicated region fallthrough
CT: control target
= control target key end

     0   :  { %s2434_s0 = inlined_call_operand.hbm [shape: f32[2,32,512], index: 0, kind: input, shape index: {}]   ;;  %s2435_s1 = inlined_call_operand.hbm [shape: f32[2,32,512], index: 1, kind: input, shape index: {}]   ;;  %s2436_s2 = inlined_call_operand.hbm [shape: f32[2,32,512], index: 2, kind: input, shape index: {}]   ;;  %s2437_s3 = inlined_call_operand.vmem [shape: f32[2,1,512], index: 3, kind: input, shape index: {}]   ;;  %s2438_s4 = inlined_call_operand.vmem [shape: bf16[96,224], index: 4, kind: input, shape index: {}]   ;;  %s2439_s5 = inlined_call_operand.vmem [shape: f32[96,1], index: 5, kind: input, shape index: {}]   ;;  %s2440_s6 = inlined_call_operand.vmem [shape: bf16[32,96], index: 6, kind: input, shape index: {}]   ;;  %s2441_s7 = inlined_call_operand.vmem [shape: f32[32,1], index: 7, kind: input, shape index: {}]   ;;  %s2442_s8 = inlined_call_operand.hbm [shape: f32[2,32,512], index: 8, kind: output, shape index: {}]  }
   0x1   :  { %2471 = sst [smem:[#allocation26_spill]] %s2435_s1 }
   0x2   :  { %2472 = sst [smem:[#allocation27_spill]] %s2436_s2 }
   0x3   :  { %2473 = sst [smem:[#allocation28_spill]] %s2437_s3 }
   0x4   :  { %2474 = sst [smem:[#allocation29_spill]] %s2438_s4 }
   0x5   :  { %2475 = sst [smem:[#allocation30_spill]] %s2439_s5 }
   0x6   :  { %2476 = sst [smem:[#allocation31_spill]] %s2440_s6 }
   0x7   :  { %2477 = sst [smem:[#allocation32_spill]] %s2441_s7 }
   0x8   :  { %2478 = sst [smem:[#allocation33_spill]] %s2442_s8 }
   0x9   :  { %13 = vsyncpa [#allocation3], 0 }
   0xa   :  { %15 = vsyncpa [#allocation3 + $0x1], 0 }
   0xb   :  { %16 = vsyncpa [#allocation6], 0 }
   0xc   :  { %18 = vsyncpa [#allocation6 + $0x1], 0 }
   0xd   :  { %19 = vsyncpa [#allocation4], 0 }
   0xe   :  { %21 = vsyncpa [#allocation4 + $0x1], 0  ;;  %s1813_s27 = smov 0   ;;  %s1815_s28 = smov 0  }
   0xf   :  { %s1817_s29 = smov 0   ;;  %s1819_s30 = smov 0  }
  0x10   :  { %s1821_s9 = smov 0   ;;  %s1823_s10 = smov 0  }
  0x11   :  { %s1825_s11 = smov 0   ;;  %s1827_s12 = smov 0  }
  0x12   :  { %s1829_s13 = smov 0   ;;  %s1831_s14 = smov 0  }
  0x13   :  { %s1833_s15 = smov 0   ;;  %s1835_s16 = smov 0  }
  0x14   :  { %s1837_s17 = smov 0   ;;  %s1839_s18 = smov 0  }
  0x15 LB: > { %2479 = sst [smem:[#allocation13_spill]] %s1695_s27  ;;  %s1884_s19 = sadd.s32 4294967295, %s1747_s18   ;;  %s1747_s18 = sphi %s1839_s18, %s27_s18   ;;  %s1743_s17 = sphi %s1837_s17, %s2542_s17   ;;  %s1739_s16 = sphi %s1835_s16, %s2551_s16   ;;  %s1735_s15 = sphi %s1833_s15, %s2540_s15   ;;  %s1731_s14 = sphi %s1831_s14, %s2539_s14   ;;  %s1727_s13 = sphi %s1829_s13, %s2550_s13   ;;  %s1723_s12 = sphi %s1827_s12, %s2549_s12   ;;  %s1719_s11 = sphi %s1825_s11, %s2538_s11   ;;  %s1715_s10 = sphi %s1823_s10, %s2548_s10   ;;  %s1711_s9 = sphi %s1821_s9, %s2547_s9   ;;  %s1707_s30 = sphi %s1819_s30, %s2537_s30   ;;  %s1703_s29 = sphi %s1817_s29, %s2546_s29   ;;  %s1699_s28 = sphi %s1815_s28, %s2545_s28   ;;  %s1695_s27 = sphi %s1813_s27, %s2544_s27  }
  0x16   : > { %2480 = sst [smem:[#allocation14_spill]] %s1707_s30  ;;  %s1275_s20 = sadd.s32 4294967294, %s1747_s18  }
  0x17   : > { %2481 = sst [smem:[#allocation15_spill]] %s1711_s9  ;;  %s36_s21 = sadd.s32 1, %s1739_s16 }
  0x18   : > { %2482 = sst [smem:[#allocation16_spill]] %s1723_s12  ;;  %s39_s22 = sadd.s32 1, %s1743_s17 }
  0x19   : > { %2483 = sst [smem:[#allocation17_spill]] %s1731_s14  ;;  %p37_p0 = scmp.ge.s32.totalorder %s36_s21, 2 }
  0x1a   : > { %2484 = sst [smem:[#allocation18_spill]] %s1735_s15  ;;  %s1890_s23 = sshll.u32 %s1739_s16, 1 }
  0x1b   : > { %2485 = sst [smem:[#allocation19_spill]] %s1739_s16  ;;  %p2460_p1 = scmp.eq.s32.totalorder %s1747_s18, 0 }
  0x1c   : > { %2486 = sst [smem:[#allocation20_spill]] %s1743_s17  ;;  %p2458_p2 = scmp.eq.s32.totalorder %s1884_s19, 0 }
  0x1d   : > { %s2553_s21 = smov (%p37_p0, %s36_s21), 0  ;;  %s2555_s22 = smov (!%p37_p0, %s39_s22), %s1743_s17 }
  0x1e   : > { %2487 = sst [smem:[#allocation21_spill]] %s2553_s21  ;;  %s2446_s24 = sshll.u32 %s2553_s21, 1 }
  0x1f   : > { %p91_p3 = scmp.ne.s32.totalorder %s1715_s10, %s1711_s9  ;;  %p97_p4 = scmp.ne.s32.totalorder %s1711_s9, %s1707_s30 }
  0x20   : > { %s1333_s8 = sadd.s32 2, %s1890_s23  ;;  %s1335_s26 = sadd.s32 2, %s2446_s24 }
  0x21   : > { %p1910_p5 = por %p91_p3, %p2460_p1  ;;  %p109_p6 = scmp.lt.s32.totalorder %s1333_s8, 3 }
  0x22   : > { %p1916_p7 = por %p97_p4, %p2458_p2  ;;  %p113_p8 = scmp.lt.s32.totalorder %s1335_s26, 3 }
  0x23   : > { %s2557_s8 = smov (!%p109_p6, %s1333_s8), 3  ;;  %p271_p9 = scmp.eq.s32.totalorder %s1884_s19, 3 }
  0x24   : > { %s2489_s6 = scalar_select %p1916_p7, 1, 0 }
  0x25   : > { %p277_p10 = scmp.eq.s32.totalorder %s1275_s20, 3  ;;  %s2559_s26 = smov (!%p113_p8, %s1335_s26), 3 }
  0x26   : > { %2490 = sst [smem:[#allocation22_spill]] %s2489_s6  ;;  %p1927_p11 = por %p271_p9, %p91_p3 }
  0x27   : > { %p1931_p12 = por %p277_p10, %p97_p4  ;;  %p2459_p13 = scmp.lt.s32.totalorder %s1747_s18, 4 }
  0x28   : > { %s2491_s25 = scalar_select %p1927_p11, 1, 0 }
  0x29   : > { %s2493_s30 = scalar_select %p1931_p12, 1, 0 }
  0x2a   : > { %2492 = sst [smem:[#allocation23_spill]] %s2491_s25  ;;  %s1939_s15 = sshll.u32 %s1743_s17, 4 }
  0x2b   : > { %2494 = sst [smem:[#allocation24_spill]] %s2493_s30  ;;  %s335_s20 = sand.u32 1, %s1747_s18  }
  0x2c   : > { %s337_s7 = sand.u32 1, %s1715_s10   ;;  %s345_s4 = sadd.s32 %s1939_s15, %s1890_s23 }
  0x2d   : > { %s1289_s5 = sshll.u32 %s337_s7, 6  ;;  %s1945_s14 = sshll.u32 %s345_s4, 7 }
  0x2e   : > { %s339_s6 = scalar_lea.vmem [#allocation5], %s1289_s5  ;;  %s2495_s1 = sld [smem:[#allocation26_spill]] }
  0x2f   : > { %s348_s9 = sshll.u32 %s339_s6, 4  ;;  %p1955_p0 = pnand %p2459_p13, %p1910_p5  ;;  %s349_s9 = int_to_ptr.vmem [resolvable:$true] %s348_s9 }
  0x30   : > { %p1297_p3 = scmp.ge.s32.totalorder %s1747_s18, 1  ;;  %p394_p4 = scmp.lt.s32.totalorder %s1747_s18, 5 }
  0x31   : > { %s1961_s7 = scalar_lea.sflag [#allocation6], %s335_s20  ;;  %p1513_p6 = pneg %p1955_p0 }
  0x32   : > { %s1524_s4 = scalar_lea.vmem %s349_s9, 1024  ;;  %s1749_s2 = smov [#allocation5]  }
  0x33   : > { %p1525_p8 = scmp.ne.s32.totalorder %s349_s9, %s1524_s4  ;;  %s1529_s5 = sshll.u32 %s1749_s2, 4  ;;  %s1530_s5 = int_to_ptr.vmem [resolvable:$false] %s1529_s5 }
  0x34   : > { %s347_s27 = scalar_lea.hbm %s2495_s1, %s1945_s14  ;;  %s1531_s3 = scalar_lea.vmem %s1530_s5, 2048 }
  0x35   : > { %p1527_p9 = pnand %p1525_p8, %p1513_p6  ;;  %p1532_p2 = scmp.lt.s32.totalorder %s349_s9, %s1530_s5 }
  0x36   : > { %p1533_p5 = scmp.lt.s32.totalorder %s1531_s3, %s1524_s4 }
  0x37   : > { %p1528_p10 = pneg %p1527_p9 }
  0x38   : > { %p1534_p13 = por %p1533_p5, %p1532_p2 }
  0x3a   : > { %p1535_p1 = pnand %p1534_p13, %p1528_p10 }
  0x3c   : > { %1538 = shalt.err (!%p1535_p1)
}
  0x3d   : > { %s2461_s6 = smov 512   ;;  %s1751_s14 = smov 256  }
  0x3e   : > { %s1752_s25 = smov 16   ;;  %p1973_p1 = pnand %p1297_p3, %p394_p4 }
  0x3f   : > { %1352 = dma.hbm_to_vmem [thread:$0]  (!%p1955_p0), %s347_s27, 1024, %s349_s9, %s1961_s7, %s2461_s6, %s1751_s14, %s1752_s25  }
  0x40   : > { %p41_p2 = scmp.ge.s32.totalorder %s2555_s22, 2  ;;  %s1277_s4 = sadd.s32 4294967295, %s1890_s23 }
  0x41   : > { %s2498_s2 = sshll.u32 %s2553_s21, 1  ;;  %p45_p13 = scmp.gt.s32.totalorder %s1277_s4, 0 }
  0x42   : > { %s1279_s5 = sadd.s32 4294967295, %s2498_s2  ;;  %s2561_s22 = smov (%p41_p2, %s2555_s22), 0 }
  0x43   : > { %2499 = sst [smem:[#allocation25_spill]] %s2561_s22  ;;  %p49_p0 = scmp.gt.s32.totalorder %s1279_s5, 0 }
  0x44   : > { %s51_s27 = ssub.s32 %s1743_s17, %s2561_s22  ;;  %s56_s9 = sadd.s32 1, %s1727_s13 }
  0x45   : > { %s2563_s4 = smov (!%p45_p13, %s1277_s4), 0  ;;  %s2565_s5 = smov (!%p49_p0, %s1279_s5), 0 }
  0x46   : > { %p63_p3 = scmp.ne.s32.totalorder %s1727_s13, %s1723_s12  ;;  %p69_p4 = scmp.ne.s32.totalorder %s1723_s12, %s1719_s11 }
  0x47   : > { %s52_s23 = ssub.s32 %s2563_s4, %s2565_s5  ;;  %s2500_s24 = ssub.s32 %s1739_s16, %s2553_s21 }
  0x48   : > { %s81_s3 = sor.u32 %s2500_s24, %s51_s27  ;;  %s53_s14 = sor.u32 %s52_s23, %s51_s27 }
  0x49   : > { %p2501_p6 = scmp.eq.s32.totalorder %s1747_s18, 0  ;;  %p54_p9 = scmp.eq.s32.totalorder %s53_s14, 0 }
  0x4a   : > { %p2503_p10 = scmp.eq.s32.totalorder %s1884_s19, 0  ;;  %p82_p2 = scmp.eq.s32.totalorder %s81_s3, 0 }
  0x4b   : > { %p1996_p8 = por %p2501_p6, %p63_p3  ;;  %s2505_s6 = ssub.s32 %s2557_s8, %s2559_s26 }
  0x4c   : > { %p2002_p5 = por %p2503_p10, %p69_p4  ;;  %s2009_s11 = sor.u32 %s2505_s6, %s51_s27 }
  0x4d   : > { %s2012_s5 = scalar_select %p54_p9, %s1727_s13, %s56_s9  }
  0x4e   : > { %s2506_s23 = sadd.s32 1, %s1715_s10  ;;  %s309_s1 = sand.u32 1, %s1727_s13  }
  0x4f   : > { %s2017_s24 = scalar_select %p82_p2, %s1715_s10, %s2506_s23  }
  0x50   : > { %s1284_s22 = sshll.u32 %s309_s1, 5  ;;  %s322_s21 = sadd.s32 %s1939_s15, %s2563_s4 }
  0x51   : > { %s1288_s14 = sshll.u32 %s322_s21, 7  ;;  %s313_s17 = scalar_lea.vmem [#allocation2], %s1284_s22 }
  0x52   : > { %s325_s16 = sshll.u32 %s313_s17, 4  ;;  %s324_s3 = scalar_lea.hbm %s2434_s0, %s1288_s14  ;;  %s326_s16 = int_to_ptr.vmem [resolvable:$true] %s325_s16 }
  0x53   : > { %p2507_p0 = scmp.lt.s32.totalorder %s1747_s18, 4  ;;  %s310_s6 = scalar_lea.sflag [#allocation3], %s309_s1 }
  0x54   : > { %s1552_s27 = scalar_lea.vmem %s326_s16, 512  ;;  %s1753_s17 = smov [#allocation2]  }
  0x55   : > { %p2029_p3 = pnand %p2507_p0, %p1996_p8  ;;  %p1553_p6 = scmp.ne.s32.totalorder %s326_s16, %s1552_s27 }
  0x56   : > { %s1557_s21 = sshll.u32 %s1753_s17, 4  ;;  %s1558_s21 = int_to_ptr.vmem [resolvable:$false] %s1557_s21 }
  0x57   : > { %p1541_p4 = pneg %p2029_p3  ;;  %s1559_s30 = scalar_lea.vmem %s1558_s21, 1024 }
  0x58   : > { %p1560_p2 = scmp.lt.s32.totalorder %s326_s16, %s1558_s21  ;;  %p1561_p13 = scmp.lt.s32.totalorder %s1559_s30, %s1552_s27 }
  0x59   : > { %p1555_p9 = pnand %p1553_p6, %p1541_p4 }
  0x5a   : > { %p1562_p12 = por %p1561_p13, %p1560_p2 }
  0x5b   : > { %p1556_p10 = pneg %p1555_p9 }
  0x5d   : > { %p1563_p11 = pnand %p1562_p12, %p1556_p10 }
  0x5f   : > { %1566 = shalt.err (!%p1563_p11)
}
  0x60   : > { %s1754_s12 = smov 128   ;;  %s2509_s1 = sld [smem:[#allocation13_spill]] }
  0x61   : > { %s1755_s22 = smov 8   ;;  %s2510_s4 = smov 512  }
  0x62   : > { %1349 = dma.hbm_to_vmem [thread:$0]  (!%p2029_p3), %s324_s3, 512, %s326_s16, %s310_s6, %s2510_s4, %s1754_s12, %s1755_s22  }
  0x63   : > { %s120_s9 = sadd.s32 1, %s1703_s29  ;;  %p127_p11 = scmp.ne.s32.totalorder %s1703_s29, %s1699_s28 }
  0x64   : > { %p2511_p12 = scmp.eq.s32.totalorder %s2009_s11, 0  ;;  %p2512_p8 = scmp.eq.s32.totalorder %s1747_s18, 0 }
  0x65   : > { %s360_s23 = sand.u32 1, %s1703_s29   ;;  %s371_s14 = sadd.s32 %s1939_s15, %s2557_s8 }
  0x66   : > { %s2046_s25 = scalar_select %p2511_p12, %s1703_s29, %s120_s9  }
  0x67   : > { %p129_p13 = por %p127_p11, %p2512_p8  ;;  %p133_p0 = scmp.ne.s32.totalorder %s1699_s28, %s2509_s1 }
  0x68   : > { %p2513_p4 = scmp.eq.s32.totalorder %s1884_s19, 0  ;;  %s1293_s26 = sshll.u32 %s360_s23, 5 }
  0x69   : > { %s1296_s17 = sshll.u32 %s371_s14, 7  ;;  %s2515_s16 = sld [smem:[#allocation27_spill]] }
  0x6a   : > { %p2057_p6 = por %p133_p0, %p2513_p4  ;;  %s362_s6 = scalar_lea.vmem [#allocation7], %s1293_s26 }
  0x6b   : > { %s374_s11 = sshll.u32 %s362_s6, 4  ;;  %p2516_p3 = scmp.lt.s32.totalorder %s1747_s18, 4  ;;  %s375_s11 = int_to_ptr.vmem [resolvable:$true] %s374_s11 }
  0x6c   : > { %s2514_s27 = scalar_select %p2057_p6, 1, 0 }
  0x6d   : > { %p2066_p9 = pnand %p2516_p3, %p129_p13  ;;  %s1580_s8 = scalar_lea.vmem %s375_s11, 512 }
  0x6e   : > { %p1581_p2 = scmp.ne.s32.totalorder %s375_s11, %s1580_s8  ;;  %s1756_s15 = smov [#allocation7]  }
  0x6f   : > { %s373_s3 = scalar_lea.hbm %s2515_s16, %s1296_s17  ;;  %p1569_p10 = pneg %p2066_p9 }
  0x70   : > { %s1585_s1 = sshll.u32 %s1756_s15, 4  ;;  %s1586_s1 = int_to_ptr.vmem [resolvable:$false] %s1585_s1 }
  0x71   : > { %p1583_p11 = pnand %p1581_p2, %p1569_p10  ;;  %s1587_s23 = scalar_lea.vmem %s1586_s1, 1024 }
  0x72   : > { %p1588_p8 = scmp.lt.s32.totalorder %s375_s11, %s1586_s1  ;;  %p1589_p0 = scmp.lt.s32.totalorder %s1587_s23, %s1580_s8 }
  0x73   : > { %p1584_p12 = pneg %p1583_p11 }
  0x74   : > { %p1590_p4 = por %p1589_p0, %p1588_p8 }
  0x76   : > { %p1591_p6 = pnand %p1590_p4, %p1584_p12 }
  0x78   : > { %1594 = shalt.err (!%p1591_p6)
}
  0x79   : > { %1355 = dma.hbm_to_vmem [thread:$0]  (!%p2066_p9), %s373_s3, 512, %s375_s11, %s1961_s7, %s2510_s4, %s1754_s12, %s1755_s22  }
  0x7a   : > { %398 = sbr.rel (%p1973_p1) target bundleno = 844 (0x34c), region = 52  ;;  %s2518_s14 = sld [smem:[#allocation16_spill]] (!%p1973_p1) }
  0x80   : > { %s400_s26 = sand.u32 1, %s2518_s14  }
  0x81   : > { %s1298_s17 = sshll.u32 %s400_s26, 5  ;;  %s401_s21 = scalar_lea.sflag [#allocation3], %s400_s26 }
  0x82   : > { %s2081_s30 = scalar_lea.vmem [#allocation2], %s1298_s17 }
  0x83   : > { %1678 = dma.done.wait (%p2002_p5), %s401_s21, 512  }
  0x84   : > { %1680 = vsyncadd (%p2002_p5), %s401_s21, 4294966784  ;;  %s2519_s16 = sld [smem:[#allocation15_spill]]  ;;  %s409_s7 = sand.u32 1, %s1884_s19  }
  0x85   : > { %s410_s22 = scalar_lea.sflag [#allocation6], %s409_s7 }
  0x8a   : > { %s411_s12 = sand.u32 1, %s2519_s16  }
  0x8b   : > { %s2091_s20 = sshll.u32 %s411_s12, 6 }
  0x8c   : > { %s413_s4 = scalar_lea.vmem [#allocation5], %s2091_s20 }
  0x8d   : > { %1682 = dma.done.wait (%p1916_p7), %s410_s22, 1024  }
  0x8e   : > { %1684 = vsyncadd (%p1916_p7), %s410_s22, 4294966272  ;;  %s420_s2 = sand.u32 1, %s1699_s28   ;;  %p2521_p1 = scmp.ne.s32.totalorder %s2514_s27, 0 }
  0x8f   : > { %s1300_s3 = sshll.u32 %s420_s2, 5 }
  0x90   : > { %s2099_s11 = scalar_lea.vmem [#allocation7], %s1300_s3 }
  0x91   : > { %1686 = dma.done.wait (%p2521_p1), %s410_s22, 512  }
  0x92   : > { %1688 = vsyncadd (%p2521_p1), %s410_s22, 4294966784  ;;  %s2522_s19 = sld [smem:[#allocation17_spill]]  ;;  %v2109_v0 = vld [vmem:[%s413_s4 + $0x20] sm:$0xff]  ;;  %v2111_v1 = vld [vmem:[%s413_s4 + $0x30] sm:$0xff]  ;;  %s1757_s6 = smov 2   ;;  %vm825_vm0 = vcmask 785408  }
  0x93   : > { %v2113_v2 = vld [vmem:[%s413_s4] sm:$0xff]  ;;  %v2118_v3 = vpack.c.bf16 %v2111_v1, %v2109_v0  ;;  %v2120_v4 = vld [vmem:[%s413_s4 + $0x10] sm:$0xff]  ;;  %v2122_v5 = vld [vmem:[%s413_s4 + $0x28] sm:$0xff]  ;;  %v1763_v33 = vmov 0   ;;  %vm615_vm1 = vcmask 15360   ;;  %vm594_vm2 = vcmask 1039360  }
  0x94   : > { %v2124_v6 = vld [vmem:[%s413_s4 + $0x38] sm:$0xff]  ;;  %v2128_v7 = vpack.c.bf16 %v2120_v4, %v2113_v2  ;;  %v2130_v8 = vld [vmem:[%s413_s4 + $0x8] sm:$0xff]  ;;  %v531_v10 = vld [vmem:[%s2081_s30 + $0x10] sm:$0xff]  ;;  %1490 = vset.pattern.permute.xlu1 %v1763_v33  ;;  %1489 = vset.pattern.permute.xlu0 %v1763_v33  ;;  %vm571_vm3 = vcmask 7168   ;;  %vm678_vm4 = vcmask 1014784   ;;  %vm657_vm5 = vcmask 31744  }
  0x95   : > { %v2132_v9 = vld [vmem:[%s413_s4 + $0x18] sm:$0xff]  ;;  %611 = vrot.lane.b32.xlu0 %v2118_v3, %s1757_s6  ;;  %v2139_v11 = vpack.c.bf16 %v2124_v6, %v2122_v5  ;;  %v529_v14 = vld [vmem:[%s2081_s30] sm:$0xff]  ;;  %v530_v16 = vld [vmem:[%s2081_s30 + $0x8] sm:$0xff]  ;;  %1049 = vmatprep.mubr.bf16.mxu1 %v1763_v33  ;;  %vm636_vm6 = vcmask 1031168  }
  0x96   : > { %v532_v12 = vld [vmem:[%s2081_s30 + $0x18] sm:$0xff]  ;;  %605 = vrot.lane.b32.xlu1 %v2128_v7, %s1757_s6  ;;  %v2147_v13 = vpack.c.bf16 %v2132_v9, %v2130_v8  ;;  %v543_v17 = vld [vmem:[%s2099_s11 + $0x10] sm:$0xff]  ;;  %v533_v20 = vpack.c.bf16 %v530_v16, %v529_v14  ;;  %v541_v24 = vld [vmem:[%s2099_s11] sm:$0xff] }
  0x97   : > { %v534_v15 = vpack.c.bf16 %v532_v12, %v531_v10  ;;  %v544_v18 = vld [vmem:[%s2099_s11 + $0x18] sm:$0xff]  ;;  %v542_v25 = vld [vmem:[%s2099_s11 + $0x8] sm:$0xff]  ;;  %s1760_s11 = smov 124  }
  0x98   : > { %p505_p5 = scmp.eq.s32.totalorder %s2522_s19, 0  ;;  %p517_p13 = scmp.eq.s32.totalorder %s2522_s19, 1  ;;  %v546_v23 = vpack.c.bf16 %v544_v18, %v543_v17  ;;  %v545_v27 = vpack.c.bf16 %v542_v25, %v541_v24 }
  0x99   : > { %613 = vrot.lane.b32.xlu0 %v2139_v11, %s1757_s6 }
  0x9a   : > { %s506_s9 = scalar_select %p505_p5, 0.0, 1.0 }
  0x9b   : > { %s2107_s8 = scalar_select %p517_p13, 0.0, 1.0 }
  0x9c   : > { %s509_s15 = sshrl.u32 %s506_s9, 16  ;;  %p508_p7 = scmp.ne.f32.partialorder %s506_s9, %s506_s9 }
  0x9d   : > { %s510_s1 = sand.u32 1, %s509_s15  ;;  %s521_s23 = sshrl.u32 %s2107_s8, 16  ;;  %607 = vrot.lane.b32.xlu0 %v2147_v13, %s1757_s6 }
  0x9e   : > { %s511_s27 = sadd.s32 32767, %s510_s1  ;;  %s522_s26 = sand.u32 1, %s521_s23 }
  0x9f   : > { %s512_s14 = sadd.s32 %s511_s27, %s506_s9  ;;  %s523_s21 = sadd.s32 32767, %s522_s26 }
  0xa0   : > { %s513_s17 = sand.u32 4294901760, %s512_s14  ;;  %p520_p6 = scmp.ne.f32.partialorder %s2107_s8, %s2107_s8 }
  0xa1   : > { %s2567_s17 = smov (%p508_p7, %s513_s17), 2143289344  ;;  %s524_s7 = sadd.s32 %s523_s21, %s2107_s8 }
  0xa2   : > { %s516_s22 = sshrl.u32 %s2567_s17, 16  ;;  %s525_s4 = sand.u32 4294901760, %s524_s7 }
  0xa3   : > { %s535_s2 = sshll.u32 %s516_s22, 16  ;;  %s1758_s9 = smov 127  }
  0xa4   : > { %s536_s3 = sor.u32 %s535_s2, %s516_s22  ;;  %584 = vrot.lane.b32.xlu1 %v2147_v13, %s1758_s9  ;;  %s2569_s4 = smov (%p520_p6, %s525_s4), 2143289344  ;;  %590 = vrot.lane.b32.xlu0 %v2139_v11, %s1758_s9 }
  0xa5   : > { %v537_v19 = vstv %s536_s3  ;;  %s528_s15 = sshrl.u32 %s2569_s4, 16  ;;  %s1759_s8 = smov 1  }
  0xa6   : > { %v540_v21 = vmul.bf16 %v537_v19, %v534_v15  ;;  %s547_s30 = sshll.u32 %s528_s15, 16  ;;  %v539_v22 = vmul.bf16 %v537_v19, %v533_v20  ;;  %s1761_s27 = smov 4  }
  0xa7   : > { %s548_s1 = sor.u32 %s547_s30, %s528_s15  ;;  %s2523_s26 = sld [smem:[#allocation29_spill]] }
  0xa8   : > { %609 = vrot.lane.b32.xlu1 %v540_v21, %s1757_s6  ;;  %v549_v26 = vstv %s548_s1  ;;  %588 = vrot.lane.b32.xlu0 %v2118_v3, %s1758_s9  ;;  %s1762_s17 = smov 126   ;;  %s2524_s7 = sld [smem:[#allocation30_spill]] }
  0xa9   : > { %v552_v28 = vmul.bf16 %v549_v26, %v546_v23  ;;  %v551_v29 = vmul.bf16 %v549_v26, %v545_v27  ;;  %s2526_s30 = sld [smem:[#allocation18_spill]]  ;;  %s2319_s21 = sshll.u32 %s2522_s19, 1 }
  0xaa   : > { %p485_p9 = scmp.lt.s32.totalorder %s2319_s21, 3  ;;  %s2529_s15 = sld [smem:[#allocation28_spill]] }
  0xab   : > { %s2331_s19 = scalar_lea.vmem [#allocation8], %s2091_s20  ;;  %s2530_s14 = sld [smem:[#allocation23_spill]] }
  0xac   : > { %603 = vrot.lane.b32.xlu1 %v539_v22, %s1757_s6  ;;  %586 = vrot.lane.b32.xlu0 %v551_v29, %s1758_s9  ;;  %s486_s22 = scalar_select %p485_p9, %s2319_s21, 3 }
  0xad   : > { %v1493_v30 = vld [vmem:[%s2523_s26 + $0x4] ss:$8 sps:$4 sm:$0xff]   ;;  %s1764_s3 = smov [#allocation8]  }
  0xae   : > { %1316 = vmatprep.mubr.msk.bf16.mxu0 %vm825_vm0, %v1493_v30  ;;  %v710_v31 = vld [vmem:[%s2524_s7 + $0x58] sm:$0xff]  ;;  %v709_v32 = vld [vmem:[%s2524_s7 + $0x50] sm:$0xff]  ;;  %v707_v34 = vld [vmem:[%s2524_s7 + $0x40] sm:$0xff] }
  0xaf   : > { %v708_v35 = vld [vmem:[%s2524_s7 + $0x48] sm:$0xff]  ;;  %v705_v36 = vld [vmem:[%s2524_s7 + $0x30] sm:$0xff]  ;;  %v706_v37 = vld [vmem:[%s2524_s7 + $0x38] sm:$0xff]  ;;  %p483_p3 = scmp.lt.s32.totalorder %s2526_s30, 1 }
  0xb0   : > { %592 = vrot.lane.b32.xlu1 %v552_v28, %s1758_s9  ;;  %567 = vrot.lane.b32.xlu0 %v2118_v3, %s1759_s8  ;;  %v703_v38 = vld [vmem:[%s2524_s7 + $0x20] sm:$0xff]  ;;  %v704_v39 = vld [vmem:[%s2524_s7 + $0x28] sm:$0xff] }
  0xb1   : > { %v701_v42 = vld [vmem:[%s2524_s7 + $0x10] sm:$0xff]  ;;  %v702_v43 = vld [vmem:[%s2524_s7 + $0x18] sm:$0xff]  ;;  %v699_v47 = vld [vmem:[%s2524_s7] sm:$0xff]  ;;  %s484_s6 = scalar_select %p483_p3, %s2526_s30, 1 }
  0xb2   : > { %v700_v48 = vld [vmem:[%s2524_s7 + $0x8] sm:$0xff]  ;;  %p2532_p2 = scmp.ne.s32.totalorder %s2530_s14, 0 }
  0xb3   : > { %s1303_s4 = sshll.u32 %s484_s6, 2  ;;  %s2531_s6 = sld [smem:[#allocation33_spill]] }
  0xb4   : > { %582 = vrot.lane.b32.xlu1 %v2128_v7, %s1758_s9  ;;  %565 = vrot.lane.b32.xlu0 %v540_v21, %s1759_s8  ;;  %s488_s2 = sadd.s32 %s1303_s4, %s486_s22  ;;  %s2359_s4 = scalar_lea.sflag [#allocation4], %s411_s12 }
  0xb5   : > { %s489_s1 = scalar_lea.vmem %s2529_s15, %s488_s2  ;;  %s1599_s9 = sshll.u32 %s1764_s3, 4  ;;  %s1600_s9 = int_to_ptr.vmem [resolvable:$false] %s1599_s9 }
  0xb6   : > { %s1601_s15 = scalar_lea.vmem %s1600_s9, 2048 }
  0xb8   : > { %569 = vrot.lane.b32.xlu1 %v2139_v11, %s1759_s8  ;;  %563 = vrot.lane.b32.xlu0 %v2147_v13, %s1759_s8 }
  0xbc   : > { %561 = vrot.lane.b32.xlu1 %v2128_v7, %s1759_s8  ;;  %674 = vrot.lane.b32.xlu0 %v2139_v11, %s1760_s11 }
  0xc0   : > { %559 = vrot.lane.b32.xlu1 %v539_v22, %s1759_s8  ;;  %672 = vrot.lane.b32.xlu0 %v2118_v3, %s1760_s11  ;;  %s2525_s8 = sld [smem:[#allocation32_spill]] }
  0xc4   : > { %676 = vrot.lane.b32.xlu1 %v552_v28, %s1760_s11  ;;  %670 = vrot.lane.b32.xlu0 %v551_v29, %s1760_s11 }
  0xc6   : > { %v978_v52 = vld [vmem:[%s2525_s8 + $0x8] sm:$0xff]  ;;  %v977_v54 = vld [vmem:[%s2525_s8] sm:$0xff]  ;;  %v980_v57 = vld [vmem:[%s2525_s8 + $0x18] sm:$0xff] }
  0xc7   : > { %v979_v59 = vld [vmem:[%s2525_s8 + $0x10] sm:$0xff] }
  0xc8   : > { %668 = vrot.lane.b32.xlu1 %v2147_v13, %s1760_s11  ;;  %653 = vrot.lane.b32.xlu0 %v2118_v3, %s1761_s27 }
  0xcc   : > { %666 = vrot.lane.b32.xlu1 %v2128_v7, %s1760_s11  ;;  %651 = vrot.lane.b32.xlu0 %v540_v21, %s1761_s27  ;;  %s1328_s11 = sshll.u32 %s2526_s30, 4 }
  0xcd   : > { %s1119_s20 = sadd.s32 %s1328_s11, %s2319_s21 }
  0xce   : > { %s1329_s30 = sshll.u32 %s1119_s20, 7 }
  0xcf   : > { %s2349_s22 = scalar_lea.hbm %s2531_s6, %s1329_s30 }
  0xd0   : > { %655 = vrot.lane.b32.xlu1 %v2139_v11, %s1761_s27  ;;  %649 = vrot.lane.b32.xlu0 %v2147_v13, %s1761_s27 }
  0xd4   : > { %647 = vrot.lane.b32.xlu1 %v2128_v7, %s1761_s27  ;;  %632 = vrot.lane.b32.xlu0 %v2139_v11, %s1762_s17 }
  0xd8   : > { %645 = vrot.lane.b32.xlu1 %v539_v22, %s1761_s27  ;;  %630 = vrot.lane.b32.xlu0 %v2118_v3, %s1762_s17  ;;  %s2527_s27 = sld [smem:[#allocation31_spill]] }
  0xdc   : > { %634 = vrot.lane.b32.xlu1 %v552_v28, %s1762_s17  ;;  %628 = vrot.lane.b32.xlu0 %v551_v29, %s1762_s17 }
  0xde   : > { %s2528_s23 = smov %s2527_s27 }
  0xe0   : > { %626 = vrot.lane.b32.xlu1 %v2147_v13, %s1762_s17  ;;  %763 = vperm.xlu0 %1489, %v709_v32  }
  0xe4   : > { %624 = vrot.lane.b32.xlu1 %v2128_v7, %s1762_s17  ;;  %758 = vperm.xlu0 %1489, %v708_v35  }
  0xe8   : > { %768 = vperm.xlu1 %1490, %v710_v31   ;;  %748 = vperm.xlu0 %1489, %v706_v37  }
  0xec   : > { %753 = vperm.xlu1 %1490, %v707_v34   ;;  %738 = vperm.xlu0 %1489, %v704_v39  }
  0xf0   : > { %743 = vperm.xlu1 %1490, %v705_v36   ;;  %728 = vperm.xlu0 %1489, %v702_v43  }
  0xf4   : > { %733 = vperm.xlu1 %1490, %v703_v38   ;;  %718 = vperm.xlu0 %1489, %v700_v48  }
  0xf8   : > { %723 = vperm.xlu1 %1490, %v701_v42   ;;  %988 = vperm.xlu0 %1489, %v978_v52  }
  0xfc   : > { %713 = vperm.xlu1 %1490, %v699_v47   ;;  %998 = vperm.xlu0 %1489, %v980_v57   ;;  %v1499_v57 = vld [vmem:[%s2523_s26 + $0x20] ss:$8 sps:$4 sm:$0xff]  }
 0x100   : > { %983 = vperm.xlu1 %1490, %v977_v54   ;;  %v1494_v54 = vld [vmem:[%s2523_s26 + $0x14] ss:$8 sps:$4 sm:$0xff]  }
 0x104   : > { %993 = vperm.xlu1 %1490, %v979_v59   ;;  %v1502_v59 = vld [vmem:[%s2523_s26 + $0x30] ss:$8 sps:$4 sm:$0xff]  }
 0x107   : > { %v612_v40 = vpop.permute.xlu0 %611 }
 0x108   : > { %v606_v41 = vpop.permute.xlu1 %605 }
 0x10b   : > { %v614_v44 = vpop.permute.xlu0 %613 }
 0x10c   : > { %v619_v46 = vsel %vm615_vm1, %v612_v40, %v614_v44 }
 0x10d   : > { %844 = vmatprep.subr.bf16.mxu0 %v619_v46 }
 0x10f   : > { %v608_v49 = vpop.permute.xlu0 %607 }
 0x110   : > { %v617_v51 = vsel %vm615_vm1, %v606_v41, %v608_v49 }
 0x116   : > { %v585_v45 = vpop.permute.xlu1 %584  ;;  %v591_v55 = vpop.permute.xlu0 %590 }
 0x11a   : > { %v610_v50 = vpop.permute.xlu1 %609  ;;  %v589_v60 = vpop.permute.xlu0 %588 }
 0x11b   : > { %v618_v53 = vsel %vm615_vm1, %v610_v50, %v612_v40  ;;  %v597_v62 = vsel %vm594_vm2, %v589_v60, %v591_v55  ;;  %v1503_v60 = vld [vmem:[%s2523_s26 + $0x44] ss:$8 sps:$4 sm:$0xff]  }
 0x11c   : > { %845 = vmatpush1.bf16.msra.mxu0 %v618_v53  ;;  %v1491_v53 = vld [vmem:[%s2523_s26] ss:$8 sps:$4 sm:$0xff]  }
 0x11d   : > { %846 = vmatprep.subr.bf16.mxu0 %v617_v51 }
 0x11e   : > { %v604_v56 = vpop.permute.xlu1 %603  ;;  %v587_v10 = vpop.permute.xlu0 %586 }
 0x11f   : > { %v616_v58 = vsel %vm615_vm1, %v604_v56, %v606_v41  ;;  %v596_v14 = vsel %vm594_vm2, %v585_v45, %v587_v10  ;;  %v1497_v56 = vld [vmem:[%s2523_s26 + $0x24] ss:$8 sps:$4 sm:$0xff]  }
 0x120   : > { %847 = vmatpush1.bf16.msra.mxu0 %v616_v58  ;;  %v1500_v58 = vld [vmem:[%s2523_s26 + $0x34] ss:$8 sps:$4 sm:$0xff]  }
 0x122   : > { %v593_v61 = vpop.permute.xlu1 %592  ;;  %v568_v16 = vpop.permute.xlu0 %567 }
 0x123   : > { %v598_v63 = vsel %vm594_vm2, %v591_v55, %v593_v61  ;;  %v1496_v55 = vld [vmem:[%s2523_s26 + $0x10] ss:$8 sps:$4 sm:$0xff]   ;;  %v1505_v61 = vld [vmem:[%s2523_s26 + $0x40] ss:$8 sps:$4 sm:$0xff]  }
 0x124   : > { %848 = vmatprep.subr.bf16.mxu0 %v598_v63  ;;  %v1508_v63 = vld [vmem:[%s2523_s26 + $0x50] ss:$8 sps:$4 sm:$0xff]  }
 0x125   : > { %849 = vmatpush1.bf16.msra.mxu0 %v597_v62  ;;  %v1506_v62 = vld [vmem:[%s2523_s26 + $0x54] ss:$8 sps:$4 sm:$0xff]  }
 0x126   : > { %v583_v12 = vpop.permute.xlu1 %582  ;;  %850 = vmatprep.subr.bf16.mxu0 %v596_v14  ;;  %v566_v19 = vpop.permute.xlu0 %565 }
 0x127   : > { %v595_v15 = vsel %vm594_vm2, %v583_v12, %v585_v45  ;;  %v574_v21 = vsel %vm571_vm3, %v566_v19, %v568_v16 }
 0x129   : > { %851 = vmatpush1.bf16.msra.mxu0 %v595_v15 }
 0x12a   : > { %v570_v17 = vpop.permute.xlu1 %569  ;;  %v564_v22 = vpop.permute.xlu0 %563 }
 0x12b   : > { %v575_v18 = vsel %vm571_vm3, %v568_v16, %v570_v17 }
 0x12c   : > { %852 = vmatprep.subr.bf16.mxu0 %v575_v18 }
 0x12d   : > { %853 = vmatpush1.bf16.msra.mxu0 %v574_v21 }
 0x12e   : > { %v562_v20 = vpop.permute.xlu1 %561  ;;  %v675_v26 = vpop.permute.xlu0 %674 }
 0x12f   : > { %v573_v24 = vsel %vm571_vm3, %v562_v20, %v564_v22 }
 0x130   : > { %854 = vmatprep.subr.bf16.mxu0 %v573_v24 }
 0x132   : > { %v560_v23 = vpop.permute.xlu1 %559  ;;  %v673_v28 = vpop.permute.xlu0 %672 }
 0x133   : > { %v572_v25 = vsel %vm571_vm3, %v560_v23, %v562_v20  ;;  %v681_v34 = vsel %vm678_vm4, %v673_v28, %v675_v26 }
 0x134   : > { %855 = vmatpush1.bf16.msra.mxu0 %v572_v25 }
 0x135   : > { %856 = vmatprep.subr.bf16.mxu0 %v2139_v11 }
 0x136   : > { %v677_v27 = vpop.permute.xlu1 %676  ;;  %v671_v31 = vpop.permute.xlu0 %670 }
 0x137   : > { %v682_v30 = vsel %vm678_vm4, %v675_v26, %v677_v27 }
 0x138   : > { %857 = vmatpush1.bf16.msra.mxu0 %v2118_v3 }
 0x139   : > { %858 = vmatprep.subr.bf16.mxu0 %v2147_v13 }
 0x13a   : > { %v669_v29 = vpop.permute.xlu1 %668  ;;  %v654_v36 = vpop.permute.xlu0 %653 }
 0x13b   : > { %v680_v35 = vsel %vm678_vm4, %v669_v29, %v671_v31 }
 0x13c   : > { %859 = vmatpush1.bf16.msra.mxu0 %v2128_v7 }
 0x13d   : > { %864 = vmatprep.subr.bf16.mxu0 %v682_v30 }
 0x13e   : > { %v667_v32 = vpop.permute.xlu1 %666  ;;  %v652_v38 = vpop.permute.xlu0 %651 }
 0x13f   : > { %v679_v37 = vsel %vm678_vm4, %v667_v32, %v669_v29  ;;  %v660_v39 = vsel %vm657_vm5, %v652_v38, %v654_v36 }
 0x140   : > { %865 = vmatpush2.bf16.msra.mxu0 %v681_v34 }
 0x141   : > { %866 = vmatprep.subr.bf16.mxu0 %v680_v35 }
 0x142   : > { %v656_v11 = vpop.permute.xlu1 %655  ;;  %v650_v7 = vpop.permute.xlu0 %649 }
 0x143   : > { %v661_v3 = vsel %vm657_vm5, %v654_v36, %v656_v11 }
 0x144   : > { %867 = vmatpush2.bf16.msra.mxu0 %v679_v37 }
 0x145   : > { %868 = vmatprep.subr.bf16.mxu0 %v661_v3 }
 0x146   : > { %v648_v13 = vpop.permute.xlu1 %647  ;;  %v633_v43 = vpop.permute.xlu0 %632 }
 0x147   : > { %v659_v41 = vsel %vm657_vm5, %v648_v13, %v650_v7 }
 0x148   : > { %869 = vmatpush2.bf16.msra.mxu0 %v660_v39 }
 0x149   : > { %870 = vmatprep.subr.bf16.mxu0 %v659_v41 }
 0x14a   : > { %v646_v40 = vpop.permute.xlu1 %645  ;;  %v631_v46 = vpop.permute.xlu0 %630 }
 0x14b   : > { %v658_v42 = vsel %vm657_vm5, %v646_v40, %v648_v13  ;;  %v639_v48 = vsel %vm636_vm6, %v631_v46, %v633_v43 }
 0x14c   : > { %871 = vmatpush2.bf16.msra.mxu0 %v658_v42 }
 0x14e   : > { %v635_v44 = vpop.permute.xlu1 %634  ;;  %v629_v49 = vpop.permute.xlu0 %628 }
 0x14f   : > { %v640_v45 = vsel %vm636_vm6, %v633_v43, %v635_v44 }
 0x150   : > { %872 = vmatprep.subr.bf16.mxu0 %v640_v45 }
 0x151   : > { %873 = vmatpush2.bf16.msra.mxu0 %v639_v48 }
 0x152   : > { %v627_v47 = vpop.permute.xlu1 %626 }
 0x153   : > { %v638_v51 = vsel %vm636_vm6, %v627_v47, %v629_v49 }
 0x154   : > { %874 = vmatprep.subr.bf16.mxu0 %v638_v51 }
 0x156   : > { %v625_v50 = vpop.permute.xlu1 %624 }
 0x157   : > { %v637_v52 = vsel %vm636_vm6, %v625_v50, %v627_v47 }
 0x158   : > { %875 = vmatpush2.bf16.msra.mxu0 %v637_v52 }
 0x15b   : > { %877 = vmatmul.mubr.bf16.vlgmr.msra.gmra.mxu0 %v1491_v53  ;;  %v764_v27 = vpop.permute.xlu0 %763 }
 0x15c   : > { %1317 = vmatprep.mubr.msk.bf16.mxu0 %vm825_vm0, %v1494_v54 }
 0x15f   : > { %v759_v32 = vpop.permute.xlu0 %758 }
 0x163   : > { %887 = vmatmul.mubr.bf16.gmra.mxu0 %v1496_v55  ;;  %v769_v29 = vpop.permute.xlu1 %768  ;;  %v749_v37 = vpop.permute.xlu0 %748 }
 0x164   : > { %1318 = vmatprep.mubr.msk.bf16.mxu0 %vm825_vm0, %v1497_v56 }
 0x167   : > { %v754_v35 = vpop.permute.xlu1 %753  ;;  %v739_v45 = vpop.permute.xlu0 %738 }
 0x16b   : > { %897 = vmatmul.mubr.bf16.gmra.mxu0 %v1499_v57  ;;  %v744_v38 = vpop.permute.xlu1 %743 }
 0x16c   : > { %1319 = vmatprep.mubr.msk.bf16.mxu0 %vm825_vm0, %v1500_v58 }
 0x16f   : > { %v734_v52 = vpop.permute.xlu1 %733 }
 0x173   : > { %907 = vmatmul.mubr.bf16.gmra.mxu0 %v1502_v59 }
 0x174   : > { %1320 = vmatprep.mubr.msk.bf16.mxu0 %vm825_vm0, %v1503_v60 }
 0x17b   : > { %917 = vmatmul.mubr.bf16.gmra.mxu0 %v1505_v61 }
 0x17c   : > { %1321 = vmatprep.mubr.msk.bf16.mxu0 %vm825_vm0, %v1506_v62 }
 0x183   : > { %927 = vmatmul.mubr.bf16.gmra.mxu0 %v1508_v63 }
 0x21b   : > { %v2288_v10 = vpop.f32.mrf.mxu0 }
 0x21d   : > { %v2290_v12 = vpop.f32.mrf.mxu0 }
 0x21f   : > { %v2292_v14 = vpop.f32.mrf.mxu0 }
 0x221   : > { %v2294_v15 = vpop.f32.mrf.mxu0 }
 0x223   : > { %v2296_v16 = vpop.f32.mrf.mxu0 }
 0x225   : > { %v2298_v17 = vpop.f32.mrf.mxu0 }
 0x227   : > { %v2300_v18 = vpop.f32.mrf.mxu0 }
 0x229   : > { %v894_v19 = vpop.f32.mrf.mxu0 }
 0x22b   : > { %v898_v20 = vpop.f32.mrf.mxu0 }
 0x22d   : > { %v900_v21 = vpop.f32.mrf.mxu0 }
 0x22f   : > { %v902_v22 = vpop.f32.mrf.mxu0 }
 0x231   : > { %v904_v23 = vpop.f32.mrf.mxu0 }
 0x232   : > { %v905_v61 = vadd.f32 %v904_v23, %v739_v45 }
 0x233   : > { %v908_v24 = vpop.f32.mrf.mxu0 }
 0x235   : > { %v910_v25 = vpop.f32.mrf.mxu0 }
 0x236   : > { %v911_v55 = vadd.f32 %v910_v25, %v744_v38 }
 0x237   : > { %v912_v26 = vpop.f32.mrf.mxu0 }
 0x238   : > { %v913_v58 = vadd.f32 %v912_v26, %v749_v37 }
 0x239   : > { %v914_v28 = vpop.f32.mrf.mxu0 }
 0x23a   : > { %v915_v48 = vadd.f32 %v914_v28, %v749_v37  ;;  %v901_v28 = vadd.f32 %v900_v21, %v734_v52  ;;  %v899_v37 = vadd.f32 %v898_v20, %v734_v52  ;;  %v1080_v52 = vlaneseq }
 0x23b   : > { %v918_v30 = vpop.f32.mrf.mxu0 }
 0x23c   : > { %v919_v53 = vadd.f32 %v918_v30, %v754_v35  ;;  %v952_v62 = vmax.f32 %v915_v48, 0.0  ;;  %v903_v30 = vadd.f32 %v902_v22, %v739_v45 }
 0x23d   : > { %v920_v31 = vpop.f32.mrf.mxu0 }
 0x23e   : > { %v921_v43 = vadd.f32 %v920_v31, %v754_v35  ;;  %v953_v31 = vmax.f32 %v919_v53, 0.0  ;;  %v951_v35 = vmax.f32 %v913_v58, 0.0  ;;  %v947_v21 = vmax.f32 %v903_v30, 0.0 }
 0x23f   : > { %v922_v34 = vpop.f32.mrf.mxu0  ;;  %v1081_v53 = vshrl.u32 %v1080_v52, 7 }
 0x240   : > { %v923_v46 = vadd.f32 %v922_v34, %v759_v32  ;;  %v954_v56 = vmax.f32 %v921_v43, 0.0  ;;  %v724_v34 = vpop.permute.xlu1 %723 }
 0x241   : > { %v924_v36 = vpop.f32.mrf.mxu0  ;;  %v891_v23 = vadd.f32 %v2298_v17, %v724_v34 }
 0x242   : > { %v925_v39 = vadd.f32 %v924_v36, %v759_v32  ;;  %v955_v59 = vmax.f32 %v923_v46, 0.0  ;;  %v950_v32 = vmax.f32 %v911_v55, 0.0  ;;  %v1086_v55 = vsub.s32 1, %v1081_v53 }
 0x243   : > { %v928_v11 = vpop.f32.mrf.mxu0  ;;  %v942_v43 = vmax.f32 %v891_v23, 0.0 }
 0x244   : > { %v929_v41 = vadd.f32 %v928_v11, %v764_v27  ;;  %v956_v49 = vmax.f32 %v925_v39, 0.0  ;;  %v969_v25 = vpack.c.bf16 %v955_v59, %v953_v31  ;;  %v948_v11 = vmax.f32 %v905_v61, 0.0 }
 0x245   : > { %v930_v3 = vpop.f32.mrf.mxu0  ;;  %v968_v26 = vpack.c.bf16 %v952_v62, %v950_v32 }
 0x246   : > { %v931_v7 = vadd.f32 %v930_v3, %v764_v27  ;;  %v957_v54 = vmax.f32 %v929_v41, 0.0  ;;  %v970_v63 = vpack.c.bf16 %v956_v49, %v954_v56  ;;  %v729_v27 = vpop.permute.xlu0 %728  ;;  %v714_v41 = vpop.permute.xlu1 %713 }
 0x247   : > { %v932_v13 = vpop.f32.mrf.mxu0  ;;  %v895_v36 = vadd.f32 %v894_v19, %v729_v27  ;;  %v889_v19 = vadd.f32 %v2296_v16, %v724_v34  ;;  %v881_v20 = vadd.f32 %v2290_v12, %v714_v41 }
 0x248   : > { %v933_v40 = vadd.f32 %v932_v13, %v769_v29  ;;  %v958_v50 = vmax.f32 %v931_v7, 0.0  ;;  %v946_v13 = vmax.f32 %v901_v28, 0.0 }
 0x249   : > { %v934_v42 = vpop.f32.mrf.mxu0  ;;  %v944_v22 = vmax.f32 %v895_v36, 0.0  ;;  %v938_v48 = vmax.f32 %v881_v20, 0.0 }
 0x24a   : > { %v935_v44 = vadd.f32 %v934_v42, %v769_v29  ;;  %v959_v47 = vmax.f32 %v933_v40, 0.0  ;;  %v909_v29 = vadd.f32 %v908_v24, %v744_v38  ;;  %v719_v24 = vpop.permute.xlu0 %718  ;;  %v893_v38 = vadd.f32 %v2300_v18, %v729_v27  ;;  %v984_v56 = vpop.permute.xlu1 %983 }
 0x24b   : > { %v885_v7 = vadd.f32 %v2294_v15, %v719_v24  ;;  %v966_v40 = vpack.c.bf16 %v948_v11, %v946_v13  ;;  %v945_v42 = vmax.f32 %v899_v37, 0.0  ;;  %v883_v17 = vadd.f32 %v2292_v14, %v719_v24 }
 0x24c   : > { %v960_v51 = vmax.f32 %v935_v44, 0.0  ;;  %v971_v60 = vpack.c.bf16 %v959_v47, %v957_v54  ;;  %v949_v3 = vmax.f32 %v909_v29, 0.0  ;;  %v943_v44 = vmax.f32 %v893_v38, 0.0  ;;  %v1078_v54 = vld [vmem:[%s489_s1] sm:$0x3] }
 0x24d   : > { %v965_v45 = vpack.c.bf16 %v947_v21, %v945_v42  ;;  %v940_v18 = vmax.f32 %v885_v7, 0.0  ;;  %v964_v46 = vpack.c.bf16 %v944_v22, %v942_v43  ;;  %v879_v47 = vadd.f32 %v2288_v10, %v714_v41  ;;  %v1510_v10 = vld [vmem:[%s2528_s23 + $0x8] sm:$0xff]  }
 0x24e   : > { %v972_v57 = vpack.c.bf16 %v960_v51, %v958_v50  ;;  %v967_v39 = vpack.c.bf16 %v951_v35, %v949_v3  ;;  %v941_v15 = vmax.f32 %v889_v19, 0.0  ;;  %v939_v16 = vmax.f32 %v883_v17, 0.0  ;;  %v1509_v51 = vld [vmem:[%s2527_s27] sm:$0xff]   ;;  %v989_v27 = vpop.permute.xlu0 %988  ;;  %s1122_s27 = sshll.u32 %s2331_s19, 4  ;;  %s2351_s27 = int_to_ptr.vmem [resolvable:$true] %s1122_s27 }
 0x24f   : > { %v962_v12 = vpack.c.bf16 %v940_v18, %v938_v48  ;;  %v937_v50 = vmax.f32 %v879_v47, 0.0  ;;  %s1595_s2 = scalar_lea.vmem %s2351_s27, 1024  ;;  %p1602_p8 = scmp.lt.s32.totalorder %s2351_s27, %s1600_s9 }
 0x250   : > { %1021 = vmatprep.subr.bf16.mxu1 %v972_v57  ;;  %v963_v49 = vpack.c.bf16 %v943_v44, %v941_v15  ;;  %p1596_p10 = scmp.ne.s32.totalorder %s2351_s27, %s1595_s2  ;;  %p1603_p0 = scmp.lt.s32.totalorder %s1601_s15, %s1595_s2 }
 0x251   : > { %1022 = vmatpush1.bf16.msra.mxu1 %v971_v60  ;;  %v961_v14 = vpack.c.bf16 %v939_v16, %v937_v50 }
 0x252   : > { %1023 = vmatprep.subr.bf16.mxu1 %v970_v63  ;;  %v1087_v63 = vrot.slane %v1078_v54, %v1086_v55  ;;  %p1597_p11 = pnand %p1596_p10, %p2532_p2  ;;  %p1604_p4 = por %p1603_p0, %p1602_p8 }
 0x254   : > { %p1598_p12 = pneg %p1597_p11 }
 0x255   : > { %1024 = vmatpush1.bf16.msra.mxu1 %v969_v25  ;;  %v994_v25 = vpop.permute.xlu1 %993 }
 0x256   : > { %1025 = vmatprep.subr.bf16.mxu1 %v968_v26  ;;  %p1605_p1 = pnand %p1604_p4, %p1598_p12 }
 0x259   : > { %1026 = vmatpush1.bf16.msra.mxu1 %v967_v39 }
 0x25a   : > { %1027 = vmatprep.subr.bf16.mxu1 %v966_v40 }
 0x25d   : > { %1028 = vmatpush1.bf16.msra.mxu1 %v965_v45 }
 0x25e   : > { %1029 = vmatprep.subr.bf16.mxu1 %v964_v46 }
 0x261   : > { %1030 = vmatpush1.bf16.msra.mxu1 %v963_v49 }
 0x262   : > { %1031 = vmatprep.subr.bf16.mxu1 %v962_v12 }
 0x265   : > { %1032 = vmatpush1.bf16.msra.mxu1 %v961_v14 }
 0x268   : > { %1324 = vmatmul.mubr.msk.bf16.vlgmr.msra.gmra.mxu1 %vm825_vm0, %v1509_v51 }
 0x269   : > { %1059 = vmatprep.mubr.bf16.mxu1 %v1763_v33  ;;  %v1082_v33 = vsub.s32 0, %v1081_v53 }
 0x26b   : > { %v1083_v59 = vrot.slane %v1078_v54, %v1082_v33 }
 0x270   : > { %1325 = vmatmul.mubr.msk.bf16.gmra.mxu1 %vm825_vm0, %v1510_v10 }
 0x328   : > { %v1051_v57 = vpop.f32.mrf.mxu1 }
 0x329   : > { %v1052_v58 = vadd.f32 %v1051_v57, %v984_v56 }
 0x32a   : > { %v1053_v60 = vpop.f32.mrf.mxu1 }
 0x32b   : > { %v1070_v61 = vadd.f32 %v1052_v58, %v2113_v2  ;;  %v1054_v62 = vadd.f32 %v1053_v60, %v984_v56 }
 0x32c   : > { %v1055_v29 = vpop.f32.mrf.mxu1 }
 0x32d   : > { %v1090_v31 = vmul.f32 %v1083_v59, %v1070_v61  ;;  %v1071_v28 = vadd.f32 %v1054_v62, %v2130_v8  ;;  %v1056_v32 = vadd.f32 %v1055_v29, %v989_v27 }
 0x32e   : > { %v1057_v34 = vpop.f32.mrf.mxu1 }
 0x32f   : > { %1098 = vst [vmem:[%s2331_s19] sm:$0xff] %v1090_v31  ;;  %v1091_v30 = vmul.f32 %v1087_v63, %v1071_v28  ;;  %v1072_v35 = vadd.f32 %v1056_v32, %v2120_v4  ;;  %v1058_v2 = vadd.f32 %v1057_v34, %v989_v27  ;;  %v999_v4 = vpop.permute.xlu0 %998 }
 0x330   : > { %v1061_v36 = vpop.f32.mrf.mxu1 }
 0x331   : > { %1099 = vst [vmem:[%s2331_s19 + $0x8] sm:$0xff] %v1091_v30  ;;  %v1092_v11 = vmul.f32 %v1083_v59, %v1072_v35  ;;  %v1073_v8 = vadd.f32 %v1058_v2, %v2132_v9  ;;  %v1062_v26 = vadd.f32 %v1061_v36, %v994_v25 }
 0x332   : > { %v1063_v37 = vpop.f32.mrf.mxu1 }
 0x333   : > { %1100 = vst [vmem:[%s2331_s19 + $0x10] sm:$0xff] %v1092_v11  ;;  %v1093_v3 = vmul.f32 %v1087_v63, %v1073_v8  ;;  %v1074_v23 = vadd.f32 %v1062_v26, %v2109_v0  ;;  %v1064_v13 = vadd.f32 %v1063_v37, %v994_v25 }
 0x334   : > { %v1065_v24 = vpop.f32.mrf.mxu1 }
 0x335   : > { %1101 = vst [vmem:[%s2331_s19 + $0x18] sm:$0xff] %v1093_v3  ;;  %v1094_v38 = vmul.f32 %v1083_v59, %v1074_v23  ;;  %v1075_v21 = vadd.f32 %v1064_v13, %v2122_v5  ;;  %v1066_v39 = vadd.f32 %v1065_v24, %v999_v4 }
 0x336   : > { %v1067_v9 = vpop.f32.mrf.mxu1 }
 0x337   : > { %1102 = vst [vmem:[%s2331_s19 + $0x20] sm:$0xff] %v1094_v38  ;;  %v1095_v7 = vmul.f32 %v1087_v63, %v1075_v21  ;;  %v1076_v0 = vadd.f32 %v1066_v39, %v2111_v1  ;;  %v1068_v22 = vadd.f32 %v1067_v9, %v999_v4 }
 0x339   : > { %1103 = vst [vmem:[%s2331_s19 + $0x28] sm:$0xff] %v1095_v7  ;;  %v1096_v5 = vmul.f32 %v1083_v59, %v1076_v0  ;;  %v1077_v40 = vadd.f32 %v1068_v22, %v2124_v6 }
 0x33b   : > { %1104 = vst [vmem:[%s2331_s19 + $0x30] sm:$0xff] %v1096_v5  ;;  %v1097_v41 = vmul.f32 %v1087_v63, %v1077_v40 }
 0x33d   : > { %1105 = vst [vmem:[%s2331_s19 + $0x38] sm:$0xff] %v1097_v41 }
 0x33e   : > { %1608 = shalt.err (!%p1605_p1)
}
 0x33f   : > { %s1609_s16 = scalar_lea.hbm %s2349_s22, 1024  ;;  %s1613_s19 = scalar_lea.hbm %s2531_s6, 4096 }
 0x340   : > { %p1610_p5 = scmp.ne.s32.totalorder %s2349_s22, %s1609_s16  ;;  %p1614_p6 = scmp.lt.s32.totalorder %s2349_s22, %s2531_s6 }
 0x341   : > { %p1615_p3 = scmp.lt.s32.totalorder %s1613_s19, %s1609_s16 }
 0x342   : > { %p1611_p13 = pnand %p1610_p5, %p2532_p2 }
 0x343   : > { %p1616_p9 = por %p1615_p3, %p1614_p6 }
 0x344   : > { %p1612_p7 = pneg %p1611_p13 }
 0x346   : > { %p1617_p10 = pnand %p1616_p9, %p1612_p7 }
 0x348   : > { %1620 = shalt.err (!%p1617_p10)
}
 0x349   : > { %s1765_s30 = smov 256   ;;  %s1766_s17 = smov 512  }
 0x34a   : > { %s1767_s21 = smov 16  }
 0x34b   : > { %1344 = dma.vmem_to_hbm [thread:$0]  (%p2532_p2), %s2351_s27, 1024, %s2349_s22, %s2359_s4, %s1765_s30, %s1766_s17, %s1767_s21  }
 0x34c PF: > { %s2533_s2 = sld [smem:[#allocation14_spill]]  ;;  %p1361_p11 = scmp.ge.s32.totalorder %s1747_s18, 2 }
 0x34d   : > { %s2534_s3 = sld [smem:[#allocation24_spill]] }
 0x352   : > { %s1137_s9 = sand.u32 1, %s2533_s2  }
 0x353   : > { %p2535_p12 = scmp.ne.s32.totalorder %s2534_s3, 0  ;;  %s1138_s15 = scalar_lea.sflag [#allocation4], %s1137_s9 }
 0x355   : > { %p1357_p8 = pnand %p1361_p11, %p2535_p12 }
 0x357   : > { %p1358_p0 = pneg %p1357_p8 }
 0x359   : > { %1690 = dma.done.wait (%p1358_p0), %s1138_s15, 1024  }
 0x35a   : > { %1692 = vsyncadd (%p1358_p0), %s1138_s15, 4294966272  ;;  %s27_s18 = sadd.s32 1, %s1747_s18   ;;  %s2537_s30 = sld [smem:[#allocation15_spill]] }
 0x35b   : > { %p2387_p4 = scmp.ge.s32.totalorder %s27_s18, 6   ;;  %s2538_s11 = sld [smem:[#allocation16_spill]] }
 0x35c   : > { %s2539_s14 = sld [smem:[#allocation19_spill]]  ;;  %s2544_s27 = smov %s1699_s28 }
 0x35d   : > { %s2540_s15 = sld [smem:[#allocation20_spill]]  ;;  %s2545_s28 = smov %s1703_s29 }
 0x35e   : > { %s2541_s22 = sld [smem:[#allocation21_spill]]  ;;  %s2546_s29 = smov %s2046_s25 }
 0x35f   : > { %s2542_s17 = sld [smem:[#allocation25_spill]]  ;;  %s2547_s9 = smov %s1715_s10 }
 0x360   : > { %s2548_s10 = smov %s2017_s24  ;;  %s2549_s12 = smov %s1727_s13 }
 0x361   : > { %s2550_s13 = smov %s2012_s5  ;;  %26 = sbr.rel (!%p2387_p4) target bundleno = 21 (0x15), region = 124 }
 0x364   : > { %s2551_s16 = smov %s2541_s22 }
 0x366   :  { %1143 = vsyncpa [#allocation3], 1 }
 0x367   :  { %1145 = vsyncpa [#allocation3 + $0x1], 1 }
 0x368   :  { %1146 = vsyncpa [#allocation6], 1 }
 0x369   :  { %1148 = vsyncpa [#allocation6 + $0x1], 1 }
 0x36a   :  { %1149 = vsyncpa [#allocation4], 1 }
 0x36b   :  { %1151 = vsyncpa [#allocation4 + $0x1], 1 }

</bundles_post_ra>
